<compile_context>
chip_gen: v6e
topology: v6e:2x2x1
jax: 0.10.0
libtpu: 0.0.40
codegen_flags: <defaults>
</compile_context>

<pallas_src>
import jax
import jax.numpy as jnp
import numpy as np
from jax.experimental import pallas as pl
from jax.experimental.pallas import tpu as pltpu


def _softplus(z):
    # torch.nn.functional.softplus with beta=1, threshold=20.
    return jnp.where(z > 20.0, z, jnp.log1p(jnp.exp(jnp.minimum(z, 20.0))))


def mlp_kernel(x_ref, wpack_ref, w2_ref, scalars_ref, out_ref):
    n = x_ref.shape[0]                       # static true batch size (gridless)

    x = x_ref[...]                           # (N, 1)
    wp = wpack_ref[...]                      # (4, H): rows = [w1, b1, b2, w3]
    w1 = wp[0:1, :]                          # (1, H)
    b1 = wp[1:2, :]                          # (1, H)
    b2 = wp[2:3, :]                          # (1, H)
    w3 = wp[3:4, :]                          # (1, H)
    w2 = w2_ref[...]                         # (H, H)
    y1 = scalars_ref[0]                      # SMEM scalar
    b3 = scalars_ref[1]                      # SMEM scalar

    # Append boundary rows x=0, x=1 -> single fused operand (one compute stream).
    xb = jax.lax.broadcasted_iota(jnp.int32, (2, 1), 0).astype(jnp.float32)
    x_all = jnp.concatenate([x, xb], axis=0)                  # (N+2, 1)

    # fc1: K=1 contraction -> VPU broadcast multiply (no MXU outer product).
    h1 = _softplus(x_all * w1 + b1)                           # (N+2, H)

    # fc2: the only real matmul -> one MXU pass for batch + boundary rows.
    h2 = _softplus(jnp.dot(h1, w2, preferred_element_type=jnp.float32) + b2)

    # fc3 (out_features=1): elementwise multiply + lane reduce (VPU/XLU).
    fvals = jnp.sum(h2 * w3, axis=1, keepdims=True)           # (N+2, 1), pre-bias
    f_x = jnp.sum(fvals[0:n, :], keepdims=True) + n * b3      # (1, 1): sum_i f(x_i)
    f0 = fvals[n:n + 1, :] + b3                               # (1, 1): f(0)
    f1 = fvals[n + 1:n + 2, :] + b3                           # (1, 1): f(1)

    # y(x) = f(batch).sum() - (f(0)+y1)*(1-x) - f(1)*x + y1, broadcast to (N, 1).
    out_ref[...] = f_x - (f0 + y1) * (1.0 - x) - f1 * x + y1


def mlp_forward(x, params, y1=1.0):
    n = x.shape[0]
    scalars = jnp.stack(
        [jnp.asarray(y1, jnp.float32), params["b3"].astype(jnp.float32)])  # (2,)

    vmem = pl.BlockSpec(memory_space=pltpu.MemorySpace.VMEM)
    smem = pl.BlockSpec(memory_space=pltpu.MemorySpace.SMEM)
    return pl.pallas_call(
        mlp_kernel,
        out_shape=jax.ShapeDtypeStruct((n, 1), jnp.float32),
        in_specs=[vmem, vmem, vmem, smem],
        out_specs=vmem,
    )(x.astype(jnp.float32), params["wpack"], params["w2"], scalars)


def init_params(hidden_size, key):
    # Deterministic init mimicking nn.Linear default: U(-1/sqrt(fan_in), +).
    ks = jax.random.split(key, 6)

    def lin(kw, kb, fan_in, fan_out):
        bound = 1.0 / np.sqrt(fan_in)
        w = jax.random.uniform(kw, (fan_in, fan_out), jnp.float32, -bound, bound)
        b = jax.random.uniform(kb, (1, fan_out), jnp.float32, -bound, bound)
        return w, b

    w1, b1 = lin(ks[0], ks[1], 1, hidden_size)                 # (1, H), (1, H)
    w2, b2 = lin(ks[2], ks[3], hidden_size, hidden_size)       # (H, H), (1, H)
    w3t, b3 = lin(ks[4], ks[5], hidden_size, 1)                # (H, 1), (1, 1)
    w3 = w3t.T                                                 # (1, H)

    # Pack the four (1, H) params into a single (4, H) VMEM operand (one DMA).
    wpack = jnp.concatenate([w1, b1, b2, w3], axis=0)          # (4, H)
    return {"wpack": wpack, "w2": w2, "b3": b3.reshape(())}


def mlp_forward_ref(x, params, y1=1.0):
    # Pure-JAX reference for validation (unpacks the fused parameter block).
    w1 = params["wpack"][0:1, :]
    b1 = params["wpack"][1:2, :]
    b2 = params["wpack"][2:3, :]
    w3 = params["wpack"][3:4, :]
    w2 = params["w2"]
    b3 = params["b3"]

    def f(z):                                                  # z: (M, 1)
        h = _softplus(z @ w1 + b1)
        h = _softplus(h @ w2 + b2)
        return jnp.sum(h @ w3.T + b3)

    f0 = f(jnp.array([[0.0]], jnp.float32))
    f1 = f(jnp.array([[1.0]], jnp.float32))
    return f(x) - (f0 + y1) * (1.0 - x) - f1 * x + y1


if __name__ == "__main__":
    hidden_size = 32
    batch = 8
    y1 = 1.0

    key = jax.random.PRNGKey(0)
    k_x, k_p = jax.random.split(key)
    x = jax.random.uniform(k_x, (batch, 1), jnp.float32)   # inputs in [0, 1)
    params = init_params(hidden_size, k_p)

    out = jax.block_until_ready(mlp_forward(x, params, y1=y1))

    ref = mlp_forward_ref(x, params, y1=y1)
    np.testing.assert_allclose(np.asarray(out), np.asarray(ref), rtol=1e-5, atol=1e-5)

    # TODO(synk): value_and_grad (autograd w.r.t. x) is left to jax.grad outside the kernel.
    print("KERNEL_OK")
</pallas_src>

<mosaic_0001>
module attributes {stable_mosaic.version = 11 : i64} {
  func.func @mlp_kernel(%arg0: memref<8x1xf32, #tpu.memory_space<vmem>>, %arg1: memref<4x32xf32, #tpu.memory_space<vmem>>, %arg2: memref<32x32xf32, #tpu.memory_space<vmem>>, %arg3: memref<2xf32, #tpu.memory_space<smem>>, %arg4: memref<8x1xf32, #tpu.memory_space<vmem>>) attributes {dimension_semantics = [], scalar_prefetch = 0 : i64, scratch_operands = 0 : i64, tpu.core_type = #tpu.core_type<tc>} {
    %c0 = arith.constant 0 : index
    %c0_0 = arith.constant 0 : index
    %0 = vector.load %arg0[%c0, %c0_0] : memref<8x1xf32, #tpu.memory_space<vmem>>, vector<8x1xf32>
    %c0_1 = arith.constant 0 : index
    %c0_2 = arith.constant 0 : index
    %1 = vector.load %arg1[%c0_1, %c0_2] : memref<4x32xf32, #tpu.memory_space<vmem>>, vector<4x32xf32>
    %2 = vector.extract_strided_slice %1 {offsets = [0, 0], sizes = [1, 32], strides = [1, 1]} : vector<4x32xf32> to vector<1x32xf32>
    %3 = vector.extract_strided_slice %1 {offsets = [1, 0], sizes = [1, 32], strides = [1, 1]} : vector<4x32xf32> to vector<1x32xf32>
    %4 = vector.extract_strided_slice %1 {offsets = [2, 0], sizes = [1, 32], strides = [1, 1]} : vector<4x32xf32> to vector<1x32xf32>
    %5 = vector.extract_strided_slice %1 {offsets = [3, 0], sizes = [1, 32], strides = [1, 1]} : vector<4x32xf32> to vector<1x32xf32>
    %c0_3 = arith.constant 0 : index
    %c0_4 = arith.constant 0 : index
    %6 = vector.load %arg2[%c0_3, %c0_4] : memref<32x32xf32, #tpu.memory_space<vmem>>, vector<32x32xf32>
    %c0_5 = arith.constant 0 : index
    %7 = memref.load %arg3[%c0_5] : memref<2xf32, #tpu.memory_space<smem>>
    %c1 = arith.constant 1 : index
    %8 = memref.load %arg3[%c1] : memref<2xf32, #tpu.memory_space<smem>>
    %9 = tpu.iota {dimensions = array<i32: 0>} : vector<2x1xi32>
    %10 = arith.sitofp %9 : vector<2x1xi32> to vector<2x1xf32>
    %11 = tpu.concatenate %0, %10 in 0 : vector<8x1xf32>, vector<2x1xf32> -> vector<10x1xf32>
    %12 = vector.broadcast %11 : vector<10x1xf32> to vector<10x32xf32>
    %13 = vector.broadcast %2 : vector<1x32xf32> to vector<10x32xf32>
    %14 = arith.mulf %12, %13 : vector<10x32xf32>
    %15 = vector.broadcast %3 : vector<1x32xf32> to vector<10x32xf32>
    %16 = arith.addf %14, %15 : vector<10x32xf32>
    %cst = arith.constant 2.000000e+01 : f32
    %17 = vector.broadcast %cst : f32 to vector<10x32xf32>
    %18 = arith.cmpf ogt, %16, %17 : vector<10x32xf32>
    %cst_6 = arith.constant 2.000000e+01 : f32
    %19 = vector.broadcast %cst_6 : f32 to vector<10x32xf32>
    %20 = arith.minimumf %16, %19 : vector<10x32xf32>
    %21 = math.exp %20 : vector<10x32xf32>
    %22 = math.log1p %21 : vector<10x32xf32>
    %23 = arith.select %18, %16, %22 : vector<10x32xi1>, vector<10x32xf32>
    %cst_7 = arith.constant dense<0.000000e+00> : vector<10x32xf32>
    %24 = tpu.matmul %23, %6, %cst_7 {dimension_numbers = #tpu.dot_dimension_numbers<[1], [0], [0], [1], [0, 0, 1, 1], [], []>} : vector<10x32xf32>, vector<32x32xf32>, vector<10x32xf32> -> vector<10x32xf32>
    %25 = vector.broadcast %4 : vector<1x32xf32> to vector<10x32xf32>
    %26 = arith.addf %24, %25 : vector<10x32xf32>
    %cst_8 = arith.constant 2.000000e+01 : f32
    %27 = vector.broadcast %cst_8 : f32 to vector<10x32xf32>
    %28 = arith.cmpf ogt, %26, %27 : vector<10x32xf32>
    %cst_9 = arith.constant 2.000000e+01 : f32
    %29 = vector.broadcast %cst_9 : f32 to vector<10x32xf32>
    %30 = arith.minimumf %26, %29 : vector<10x32xf32>
    %31 = math.exp %30 : vector<10x32xf32>
    %32 = math.log1p %31 : vector<10x32xf32>
    %33 = arith.select %28, %26, %32 : vector<10x32xi1>, vector<10x32xf32>
    %34 = vector.broadcast %5 : vector<1x32xf32> to vector<10x32xf32>
    %35 = arith.mulf %33, %34 : vector<10x32xf32>
    %cst_10 = arith.constant dense<0.000000e+00> : vector<10xf32>
    %36 = vector.multi_reduction <add>, %35, %cst_10 [1] : vector<10x32xf32> to vector<10xf32>
    %37 = vector.shape_cast %36 : vector<10xf32> to vector<10x1xf32>
    %38 = vector.extract_strided_slice %37 {offsets = [0, 0], sizes = [8, 1], strides = [1, 1]} : vector<10x1xf32> to vector<8x1xf32>
    %39 = vector.shape_cast %38 : vector<8x1xf32> to vector<1x8x1xf32>
    %cst_11 = arith.constant dense<0.000000e+00> : vector<1xf32>
    %40 = vector.multi_reduction <add>, %39, %cst_11 [1, 2] : vector<1x8x1xf32> to vector<1xf32>
    %41 = vector.shape_cast %40 : vector<1xf32> to vector<1x1x1xf32>
    %42 = vector.extract %41[0, 0, 0] : f32 from vector<1x1x1xf32>
    %43 = vector.broadcast %42 : f32 to vector<1x1xf32>
    %cst_12 = arith.constant 8.000000e+00 : f32
    %44 = arith.mulf %cst_12, %8 : f32
    %45 = vector.broadcast %44 : f32 to vector<1x1xf32>
    %46 = arith.addf %43, %45 : vector<1x1xf32>
    %47 = vector.extract_strided_slice %37 {offsets = [8, 0], sizes = [1, 1], strides = [1, 1]} : vector<10x1xf32> to vector<1x1xf32>
    %48 = vector.broadcast %8 : f32 to vector<1x1xf32>
    %49 = arith.addf %47, %48 : vector<1x1xf32>
    %50 = vector.extract_strided_slice %37 {offsets = [9, 0], sizes = [1, 1], strides = [1, 1]} : vector<10x1xf32> to vector<1x1xf32>
    %51 = vector.broadcast %8 : f32 to vector<1x1xf32>
    %52 = arith.addf %50, %51 : vector<1x1xf32>
    %53 = vector.broadcast %7 : f32 to vector<1x1xf32>
    %54 = arith.addf %49, %53 : vector<1x1xf32>
    %cst_13 = arith.constant 1.000000e+00 : f32
    %55 = vector.broadcast %cst_13 : f32 to vector<8x1xf32>
    %56 = arith.subf %55, %0 : vector<8x1xf32>
    %57 = vector.broadcast %54 : vector<1x1xf32> to vector<8x1xf32>
    %58 = arith.mulf %57, %56 : vector<8x1xf32>
    %59 = vector.broadcast %46 : vector<1x1xf32> to vector<8x1xf32>
    %60 = arith.subf %59, %58 : vector<8x1xf32>
    %61 = vector.broadcast %52 : vector<1x1xf32> to vector<8x1xf32>
    %62 = arith.mulf %61, %0 : vector<8x1xf32>
    %63 = arith.subf %60, %62 : vector<8x1xf32>
    %64 = vector.broadcast %7 : f32 to vector<8x1xf32>
    %65 = arith.addf %63, %64 : vector<8x1xf32>
    %c0_14 = arith.constant 0 : index
    %c0_15 = arith.constant 0 : index
    %66 = vector.load %arg4[%c0_14, %c0_15] : memref<8x1xf32, #tpu.memory_space<vmem>>, vector<8x1xf32>
    tpu.vector_store %arg4[%c0_14, %c0_15], %65 {strides = array<i32>} : memref<8x1xf32, #tpu.memory_space<vmem>>, vector<8x1xf32>,
    return
  }
}

</mosaic_0001>

<bundles_post_ra>
// kernel: tpu_custom_call.1
= control target key start
LH: loop header
LB: loop body
LE: loop exit
PB: predicated region body
PF: predicated region fallthrough
CT: control target
= control target key end

     0   :  { %9 = vsyncpa [#allocation3], 0  ;;  %s428_s0 = inlined_call_operand.vmem [shape: f32[8,1], index: 0, kind: input, shape index: {}]   ;;  %s429_s1 = inlined_call_operand.vmem [shape: f32[4,32], index: 1, kind: input, shape index: {}]   ;;  %s430_s2 = inlined_call_operand.hbm [shape: f32[32,32], index: 2, kind: input, shape index: {}]   ;;  %s431_s3 = inlined_call_operand.vmem [shape: f32[2], index: 3, kind: input, shape index: {}]   ;;  %s432_s4 = inlined_call_operand.vmem [shape: f32[8,1], index: 4, kind: output, shape index: {}]  }
   0x1   :  { %10 = vsyncpa [#allocation4], 0  ;;  %s352_s15 = smov [#allocation2]   ;;  %s33_s19 = sshll.u32 %s431_s3, 4  ;;  %s34_s19 = int_to_ptr.vmem [resolvable:$true] %s33_s19 }
   0x2   :  { %s20_s16 = sshll.u32 %s352_s15, 4  ;;  %s21_s16 = int_to_ptr.vmem [resolvable:$true] %s20_s16 }
   0x3   :  { %s324_s20 = scalar_lea.vmem %s21_s16, 512  ;;  %p329_p1 = scmp.lt.s32.totalorder %s21_s16, %s21_s16 }
   0x4   :  { %p325_p0 = scmp.ne.s32.totalorder %s21_s16, %s324_s20  ;;  %p330_p2 = scmp.lt.s32.totalorder %s324_s20, %s324_s20 }
   0x6   :  { %p331_p3 = por %p330_p2, %p329_p1 }
   0x8   :  { %p332_p4 = pnand %p331_p3, %p325_p0 }
   0xa   :  { %335 = shalt.err (!%p332_p4)
}
   0xb   :  { %s353_s21 = smov 128   ;;  %s354_s22 = smov 8  }
   0xc   :  { %26 = dma.hbm_to_vmem [thread:$0]  %s430_s2, 512, %s21_s16, [#allocation3], %s353_s21, %s353_s21, %s354_s22  }
   0xd   :  { %s336_s25 = scalar_lea.vmem %s34_s19, 16  ;;  %p341_p6 = scmp.lt.s32.totalorder %s34_s19, %s34_s19 }
   0xe   :  { %p337_p5 = scmp.ne.s32.totalorder %s34_s19, %s336_s25  ;;  %p342_p7 = scmp.lt.s32.totalorder %s336_s25, %s336_s25 }
  0x10   :  { %p343_p8 = por %p342_p7, %p341_p6 }
  0x12   :  { %p344_p9 = pnand %p343_p8, %p337_p5 }
  0x14   :  { %347 = shalt.err (!%p344_p9)
}
  0x15   :  { %s355_s3 = smov [#allocation5]  }
  0x16   :  { %36 = dma.vmem_to_smem %s34_s19, 16, %s355_s3, [#allocation4]  }
  0x17   :  { %348 = dma.done.wait [#allocation3], 512  }
  0x18   :  { %349 = vsyncadd [#allocation3], 4294966784 }
  0x19   :  { %350 = dma.done.wait [#allocation4], 16  }
  0x1a   :  { %351 = vsyncadd [#allocation4], 4294967280 }
  0x1b   :  { %43 = sfence }
  0x1c   :  { %v391_v0 = vld [vmem:[%s428_s0] sm:$0xff]  ;;  %v52_v1 = vlaneseq  ;;  %v356_v2 = vmov 0   ;;  %v49_v5 = vld [vmem:[#allocation2 + $0x18] sm:$0xff]  ;;  %v48_v6 = vld [vmem:[#allocation2 + $0x10] sm:$0xff]  ;;  %vm109_vm1 = vcmask 261120   ;;  %vm228_vm7 = vcmask 254976  }
  0x1d   :  { %299 = vset.pattern.permute.xlu0 %v356_v2  ;;  %281 = vmatprep.subr.mxu0 %v49_v5  ;;  %v47_v7 = vld [vmem:[#allocation2 + $0x8] sm:$0xff]  ;;  %v46_v8 = vld [vmem:[#allocation2] sm:$0xff]  ;;  %vm232_vm10 = vcmask 7168   ;;  %s50_s28 = sld [smem:[#allocation5]] }
  0x1e   :  { %57 = vperm.xlu0 %299, %v391_v0   ;;  %v394_v3 = vshrl.u32 %v52_v1, 7  ;;  %282 = vmatpush3.msra.mxu0 %v49_v5  ;;  %v401_v10 = vld [vmem:[%s429_s1] sm:$0xf]  ;;  %s272_s1 = sld [smem:[#allocation5 + $0x1]] }
  0x1f   :  { %283 = vmatprep.subr.mxu0 %v48_v6 }
  0x20   :  { %v54_v4 = vcvt.s32.f32 %v394_v3  ;;  %284 = vmatpush3.msra.mxu0 %v48_v6  ;;  %v67_v9 = vsub.s32 0, %v394_v3  ;;  %v73_v11 = vsub.s32 1, %v394_v3  ;;  %v107_v44 = vsub.s32 2, %v394_v3 }
  0x21   :  { %285 = vmatprep.subr.mxu0 %v47_v7  ;;  %v221_v61 = vsub.s32 3, %v394_v3 }
  0x22   :  { %62 = vperm.xlu0 %299, %v54_v4   ;;  %286 = vmatpush3.msra.mxu0 %v47_v7  ;;  %v68_v12 = vrot.slane %v401_v10, %v67_v9  ;;  %v74_v13 = vrot.slane %v401_v10, %v73_v11  ;;  %v108_v45 = vrot.slane %v401_v10, %v107_v44 }
  0x23   :  { %287 = vmatprep.subr.mxu0 %v46_v8  ;;  %v222_v6 = vrot.slane %v401_v10, %v221_v61 }
  0x24   :  { %288 = vmatpush3.msra.mxu0 %v46_v8  ;;  %s244_s29 = smul.f32 8.0, %s272_s1 }
  0x99   :  { %v58_v14 = vpop.permute.xlu0 %57 }
  0x9a   :  { %v69_v15 = vmul.f32 %v68_v12, %v58_v14 }
  0x9c   :  { %v75_v16 = vadd.f32 %v74_v13, %v69_v15 }
  0x9d   :  { %v63_v17 = vpop.permute.xlu0 %62 }
  0x9e   :  { %v79_v18 = vmin.f32 %v75_v16, 20.0  ;;  %v70_v19 = vmul.f32 %v68_v12, %v63_v17  ;;  %vm77_vm2 = vcmp.gt.f32.partialorder %v75_v16, 20.0 }
  0xa0   :  { %v81_v20 = vmul.f32 1.442695, %v79_v18  ;;  %v76_v21 = vadd.f32 %v74_v13, %v70_v19 }
  0xa2   :  { %300 = vpow2.f32 %v81_v20  ;;  %v80_v22 = vmin.f32 %v76_v21, 20.0  ;;  %vm78_vm4 = vcmp.gt.f32.partialorder %v76_v21, 20.0 }
  0xa4   :  { %v83_v23 = vmul.f32 1.442695, %v80_v22 }
  0xa6   :  { %302 = vpow2.f32 %v83_v23 }
  0xaf   :  { %v301_v24 = vpop.eup %300 }
  0xb0   :  { %v85_v25 = vadd.f32 1.0, %v301_v24  ;;  %v88_v28 = vmul.f32 -0.5, %v301_v24  ;;  %v91_v31 = vand.u32 2147483647, %v301_v24 }
  0xb2   :  { %304 = vlog2.f32 %v85_v25  ;;  %v89_v29 = vadd.f32 1.0, %v88_v28  ;;  %vm92_vm0 = vcmp.lt.f32.partialorder %v91_v31, 0.0004427343 }
  0xb3   :  { %v303_v26 = vpop.eup %302 }
  0xb4   :  { %v94_v27 = vadd.f32 1.0, %v303_v26  ;;  %v97_v30 = vmul.f32 -0.5, %v303_v26  ;;  %v90_v34 = vmul.f32 %v301_v24, %v89_v29  ;;  %v100_v36 = vand.u32 2147483647, %v303_v26 }
  0xb5   :  { %v247_v29 = vstv %s272_s1 }
  0xb6   :  { %306 = vlog2.f32 %v94_v27  ;;  %v98_v35 = vadd.f32 1.0, %v97_v30  ;;  %vm101_vm3 = vcmp.lt.f32.partialorder %v100_v36, 0.0004427343  ;;  %v245_v36 = vstv %s244_s29 }
  0xb8   :  { %v99_v41 = vmul.f32 %v303_v26, %v98_v35 }
  0xbf   :  { %v305_v32 = vpop.eup %304 }
  0xc0   :  { %v87_v33 = vmul.f32 0.6931472, %v305_v32  ;;  %v249_v32 = vstv %s50_s28 }
  0xc2   :  { %v93_v37 = vsel %vm92_vm0, %v90_v34, %v87_v33  ;;  %v251_v34 = vsub.f32 1.0, %v391_v0 }
  0xc3   :  { %v307_v38 = vpop.eup %306  ;;  %v103_v39 = vsel %vm77_vm2, %v75_v16, %v93_v37 }
  0xc4   :  { %289 = vmatprep.mubr.msk.f32.mxu0 %vm109_vm1, %v103_v39  ;;  %v96_v40 = vmul.f32 0.6931472, %v307_v38 }
  0xc6   :  { %v102_v42 = vsel %vm101_vm3, %v99_v41, %v96_v40 }
  0xc7   :  { %v104_v43 = vsel %vm78_vm4, %v76_v21, %v102_v42 }
  0xc8   :  { %290 = vmatmul.mubr.msk.f32.vlgmr.msra.gmra.mxu0 %vm109_vm1, %v104_v43 }
 0x188   :  { %v291_v46 = vpop.f32.mrf.mxu0 }
 0x189   :  { %v188_v47 = vadd.f32 %v291_v46, %v108_v45 }
 0x18a   :  { %v182_v48 = vpop.f32.mrf.mxu0 }
 0x18b   :  { %v194_v49 = vmin.f32 %v188_v47, 20.0  ;;  %v183_v50 = vadd.f32 %v182_v48, %v108_v45  ;;  %vm192_vm6 = vcmp.gt.f32.partialorder %v188_v47, 20.0 }
 0x18d   :  { %v197_v51 = vmul.f32 1.442695, %v194_v49  ;;  %v193_v52 = vmin.f32 %v183_v50, 20.0  ;;  %vm191_vm9 = vcmp.gt.f32.partialorder %v183_v50, 20.0 }
 0x18f   :  { %308 = vpow2.f32 %v197_v51  ;;  %v195_v53 = vmul.f32 1.442695, %v193_v52 }
 0x191   :  { %310 = vpow2.f32 %v195_v53 }
 0x19c   :  { %v309_v54 = vpop.eup %308 }
 0x19d   :  { %v208_v55 = vadd.f32 1.0, %v309_v54  ;;  %v211_v58 = vmul.f32 -0.5, %v309_v54  ;;  %v214_v62 = vand.u32 2147483647, %v309_v54 }
 0x19e   :  { %v311_v56 = vpop.eup %310 }
 0x19f   :  { %312 = vlog2.f32 %v208_v55  ;;  %v199_v57 = vadd.f32 1.0, %v311_v56  ;;  %v202_v59 = vmul.f32 -0.5, %v311_v56  ;;  %v212_v60 = vadd.f32 1.0, %v211_v58 }
 0x1a0   :  { %v205_v2 = vand.u32 2147483647, %v311_v56  ;;  %vm215_vm5 = vcmp.lt.f32.partialorder %v214_v62, 0.0004427343 }
 0x1a1   :  { %314 = vlog2.f32 %v199_v57  ;;  %v203_v63 = vadd.f32 1.0, %v202_v59  ;;  %v213_v5 = vmul.f32 %v309_v54, %v212_v60 }
 0x1a2   :  { %vm206_vm8 = vcmp.lt.f32.partialorder %v205_v2, 0.0004427343 }
 0x1a3   :  { %v204_v13 = vmul.f32 %v311_v56, %v203_v63 }
 0x1ac   :  { %v313_v1 = vpop.eup %312 }
 0x1ad   :  { %v210_v4 = vmul.f32 0.6931472, %v313_v1 }
 0x1ae   :  { %v315_v7 = vpop.eup %314 }
 0x1af   :  { %v216_v8 = vsel %vm215_vm5, %v213_v5, %v210_v4  ;;  %v201_v12 = vmul.f32 0.6931472, %v315_v7 }
 0x1b0   :  { %v218_v14 = vsel %vm192_vm6, %v188_v47, %v216_v8 }
 0x1b1   :  { %v224_v15 = vmul.f32 %v222_v6, %v218_v14  ;;  %v207_v16 = vsel %vm206_vm8, %v204_v13, %v201_v12 }
 0x1b2   :  { %v217_v17 = vsel %vm191_vm9, %v183_v50, %v207_v16 }
 0x1b3   :  { %v229_v18 = vsel %vm228_vm7, %v224_v15, 0.0  ;;  %v223_v19 = vmul.f32 %v222_v6, %v217_v17 }
 0x1b4   :  { %230 = vadd.xlane.f32.xlu0 %v229_v18 }
 0x1b5   :  { %v225_v20 = vsel %vm109_vm1, %v223_v19, 0.0 }
 0x1b6   :  { %226 = vadd.xlane.f32.xlu1 %v225_v20 }
 0x23d   :  { %v231_v30 = vpop.xlane.xlu0 %230 }
 0x23e   :  { %v248_v31 = vadd.f32 %v247_v29, %v231_v30 }
 0x23f   :  { %v227_v10 = vpop.xlane.xlu1 %226 }
 0x240   :  { %v233_v21 = vsel %vm232_vm10, %v227_v10, 0.0  ;;  %v250_v33 = vadd.f32 %v249_v32, %v248_v31  ;;  %v261_v37 = vrot.slane %v248_v31, %v73_v11 }
 0x241   :  { %234 = vadd.xlane.f32.xlu1 %v233_v21 }
 0x242   :  { %v255_v35 = vrot.slane %v250_v33, %v67_v9  ;;  %v262_v41 = vmul.f32 %v261_v37, %v391_v0 }
 0x244   :  { %v256_v40 = vmul.f32 %v255_v35, %v251_v34 }
 0x2ca   :  { %v235_v22 = vpop.xlane.xlu1 %234 }
 0x2cb   :  { %v236_v23 = vrot.slane %v235_v22, 4 }
 0x2cd   :  { %v237_v24 = vadd.f32 %v236_v23, %v235_v22 }
 0x2cf   :  { %v238_v25 = vrot.slane %v237_v24, 2 }
 0x2d1   :  { %v239_v26 = vadd.f32 %v238_v25, %v237_v24 }
 0x2d3   :  { %v240_v27 = vrot.slane %v239_v26, 1 }
 0x2d5   :  { %v241_v28 = vadd.f32 %v240_v27, %v239_v26 }
 0x2d7   :  { %292 = vpush %v241_v28 }
 0x308   :  { %s293_s30 = spop %292 }
 0x309   :  { %v243_v38 = vstv %s293_s30 }
 0x30a   :  { %v246_v39 = vadd.f32 %v245_v36, %v243_v38 }
 0x30c   :  { %v257_v42 = vsub.f32 %v246_v39, %v256_v40 }
 0x30e   :  { %v263_v43 = vsub.f32 %v257_v42, %v262_v41 }
 0x310   :  { %v264_v44 = vadd.f32 %v263_v43, %v249_v32 }
 0x312   :  { %265 = vst.msk [vmem:[%s432_s4] sm:$0xff] %vm232_vm10, %v264_v44 }
 0x313   :  { %270 = vsyncpa [#allocation3], 1 }
 0x314   :  { %271 = vsyncpa [#allocation4], 1 }

</bundles_post_ra>
